<compile_context>
chip_gen: v7x
topology: tpu7x:2x2x1
jax: 0.10.0
libtpu: 0.0.40
codegen_flags: <defaults>
</compile_context>

<pallas_src>
import functools
import math

import numpy as np
import jax
import jax.numpy as jnp
from jax import lax
from jax.experimental import pallas as pl
from jax.experimental.pallas import tpu as pltpu

# Optional MXU-operand dtype (set to jnp.bfloat16 on v6e/v7x for ~3-4x matmul
# throughput on compute-bound shapes; accumulation stays f32, softmax stays f32).
# Left None so outputs match the f32 reference at tight tolerance.
MXU_OPERAND_DTYPE = None


def _mxu_in(x):
    return x if MXU_OPERAND_DTYPE is None else x.astype(MXU_OPERAND_DTYPE)


@functools.lru_cache(maxsize=1)
def _vmem_limit_bytes():
    """Per-generation VMEM limit: ~7/8 of physical capacity, safe fallback."""
    cap = None
    try:
        info = pltpu.get_tpu_info()
        cap = getattr(info, "vmem_capacity_bytes", None)
    except Exception:
        cap = None
    if not cap:
        cap = 64 * 1024 * 1024  # conservative: v7x physical VMEM per TensorCore
    return int(cap) * 7 // 8


def _floor_multiple(x, q):
    return max(q, (x // q) * q)


# ----------------------------------------------------------------------------
# Kernel 1: linear layer  y = x @ Wt + b   (M/N/K tiled, f32 accumulator)
# ----------------------------------------------------------------------------
def linear_kernel(x_ref, wt_ref, b_ref, o_ref, acc_ref):
    # x_ref: (bm, bk), wt_ref: (bk, bn), b_ref: (1, bn), o_ref/acc_ref: (bm, bn)
    @pl.when(pl.program_id(2) == 0)
    def _():
        acc_ref[...] = jnp.zeros_like(acc_ref)

    acc_ref[...] += jnp.dot(_mxu_in(x_ref[...]), _mxu_in(wt_ref[...]),
                            preferred_element_type=jnp.float32)

    @pl.when(pl.program_id(2) == pl.num_programs(2) - 1)
    def _():
        o_ref[...] = (acc_ref[...] + b_ref[...].astype(jnp.float32)).astype(o_ref.dtype)


def pallas_linear(x2d, wt, bias, *, block_m=512, block_n=512, block_k=512):
    """x2d: (M, K); wt: (K, N) already transposed; bias: (N,)."""
    M, K = x2d.shape
    N = wt.shape[1]

    # Round tiles to hardware-friendly multiples instead of falling back to the
    # full dimension (which was a latent VMEM-OOM path, fatal first on v7x).
    bm = M if M <= block_m else _floor_multiple(block_m, 8)
    bn = N if N <= block_n else _floor_multiple(block_n, 128)
    bk = K if K <= block_k else _floor_multiple(block_k, 128)
    if K % bk != 0:
        # TODO(synk): ragged-K masking; full-K fallback keeps the reduction exact.
        bk = K

    grid = (pl.cdiv(M, bm), pl.cdiv(N, bn), K // bk)

    return pl.pallas_call(
        linear_kernel,
        out_shape=jax.ShapeDtypeStruct((M, N), x2d.dtype),
        grid_spec=pltpu.PrefetchScalarGridSpec(
            num_scalar_prefetch=0,
            grid=grid,
            in_specs=[
                pl.BlockSpec((bm, bk), lambda i, j, kk: (i, kk)),
                pl.BlockSpec((bk, bn), lambda i, j, kk: (kk, j)),
                pl.BlockSpec((1, bn), lambda i, j, kk: (0, j)),
            ],
            out_specs=pl.BlockSpec((bm, bn), lambda i, j, kk: (i, j)),
            scratch_shapes=[pltpu.VMEM((bm, bn), jnp.float32)],
        ),
        compiler_params=pltpu.CompilerParams(
            dimension_semantics=("parallel", "parallel", "arbitrary"),
            vmem_limit_bytes=_vmem_limit_bytes(),
        ),
    )(x2d, wt, bias.reshape(1, N))


# ----------------------------------------------------------------------------
# Kernel 2: attention core + fused fc_o — one (batch, q-tile) per grid step
# ----------------------------------------------------------------------------
def attn_fused_kernel(q_ref, k_ref, v_ref, wo_ref, bo_ref, o_ref, *, h, d_kp, d_v):
    # q_ref : (1, tq, h*d_kp)   k_ref : (1, nk, h*d_kp)   v_ref : (1, nk, h*d_v)
    # wo_ref: (h*d_v, d_model)  bo_ref: (1, d_model)      o_ref : (1, tq, d_model)
    q_all = q_ref[0]
    k_all = k_ref[0]
    v_all = v_ref[0]
    tq = q_all.shape[0]
    d_model = o_ref.shape[-1]

    # Single f32 accumulator for the fused output projection; only one head's
    # (tq, d_v) output is live at a time (no concat, low vreg/VMEM pressure).
    out_acc = jnp.zeros((tq, d_model), jnp.float32)

    for hi in range(h):  # static unroll over heads (small h)
        # Lane-aligned static slices: d_kp is a multiple of 128 (padded at init).
        # 1/sqrt(d_k) is already folded into the fc_q weights.
        q = _mxu_in(q_all[:, hi * d_kp:(hi + 1) * d_kp])
        k = _mxu_in(k_all[:, hi * d_kp:(hi + 1) * d_kp])
        v = v_all[:, hi * d_v:(hi + 1) * d_v]

        # s = q @ k^T without materializing k^T (contract last dims), f32 acc.
        s = lax.dot_general(
            q, k,
            dimension_numbers=(((1,), (1,)), ((), ())),
            preferred_element_type=jnp.float32,
        )  # (tq, nk) f32

        # Numerically stable softmax in f32; denominator applied to the small
        # (tq, d_v) PV output, not the (tq, nk) probs.
        m = jnp.max(s, axis=-1, keepdims=True)
        p = jnp.exp(s - m)
        denom = jnp.sum(p, axis=-1, keepdims=True)

        # TODO(synk): train-mode dropout on attention probs not implemented.
        o = jnp.dot(_mxu_in(p.astype(v_all.dtype)), _mxu_in(v),
                    preferred_element_type=jnp.float32)
        o = o * pl.reciprocal(denom)  # exact reciprocal (review correctness note)

        # Fused fc_o: accumulate this head's contribution directly.
        wo_h = wo_ref[hi * d_v:(hi + 1) * d_v, :]  # (d_v, d_model), static slice
        out_acc = out_acc + jnp.dot(_mxu_in(o.astype(wo_h.dtype)), _mxu_in(wo_h),
                                    preferred_element_type=jnp.float32)

    # Lane-dense (tq, d_model) store.
    o_ref[0] = (out_acc + bo_ref[...].astype(jnp.float32)).astype(o_ref.dtype)


def pallas_fused_attention(q, k, v, wo, bo, *, h, d_kp, d_v, d_model, block_q=256):
    """q: (b, nq, h*d_kp), k: (b, nk, h*d_kp), v: (b, nk, h*d_v),
    wo: (h*d_v, d_model), bo: (d_model,) -> (b, nq, d_model)."""
    b, nq, _ = q.shape
    nk = k.shape[1]

    tq = nq if nq <= block_q else _floor_multiple(block_q, 8)
    grid = (b, pl.cdiv(nq, tq))

    kern = functools.partial(attn_fused_kernel, h=h, d_kp=d_kp, d_v=d_v)
    # TODO(synk): if profiling on v5e shows exposed K/V DMA, add
    # pipeline_mode=pl.Buffered(3) to the K/V specs once a kv-tile axis lands.
    return pl.pallas_call(
        kern,
        out_shape=jax.ShapeDtypeStruct((b, nq, d_model), q.dtype),
        grid_spec=pltpu.PrefetchScalarGridSpec(
            num_scalar_prefetch=0,
            grid=grid,
            in_specs=[
                pl.BlockSpec((1, tq, h * d_kp), lambda bi, qi: (bi, qi, 0)),
                pl.BlockSpec((1, nk, h * d_kp), lambda bi, qi: (bi, 0, 0)),  # resident per batch
                pl.BlockSpec((1, nk, h * d_v), lambda bi, qi: (bi, 0, 0)),   # resident per batch
                pl.BlockSpec((h * d_v, d_model), lambda bi, qi: (0, 0)),     # Wo resident
                pl.BlockSpec((1, d_model), lambda bi, qi: (0, 0)),           # bo resident
            ],
            out_specs=pl.BlockSpec((1, tq, d_model), lambda bi, qi: (bi, qi, 0)),
        ),
        compiler_params=pltpu.CompilerParams(
            dimension_semantics=("parallel", "parallel"),
            vmem_limit_bytes=_vmem_limit_bytes(),
        ),
    )(q, k, v, wo, bo.reshape(1, d_model))


# ----------------------------------------------------------------------------
# Module: parameter init (PyTorch semantics), kernel-side param preparation
# ----------------------------------------------------------------------------
def init_params(key, d_model, d_k, d_v, h, dtype=jnp.float32):
    """Mimics init_weights(): Linear weights ~ N(0, 0.001), biases = 0.
    Weights are stored already transposed as (in_features, out_features)."""
    ks = jax.random.split(key, 4)
    std = 0.001
    return {
        "fc_q_wt": (std * jax.random.normal(ks[0], (h * d_k, d_model), dtype)).T,
        "fc_q_b": jnp.zeros((h * d_k,), dtype),
        "fc_k_wt": (std * jax.random.normal(ks[1], (h * d_k, d_model), dtype)).T,
        "fc_k_b": jnp.zeros((h * d_k,), dtype),
        "fc_v_wt": (std * jax.random.normal(ks[2], (h * d_v, d_model), dtype)).T,
        "fc_v_b": jnp.zeros((h * d_v,), dtype),
        "fc_o_wt": (std * jax.random.normal(ks[3], (d_model, h * d_v), dtype)).T,
        "fc_o_b": jnp.zeros((d_model,), dtype),
    }


def prepare_params(raw, *, d_model, d_k, d_v, h, pad_head_to=128):
    """One-time weight transforms so the kernels do zero extra runtime work:
    * fold 1/sqrt(d_k) into fc_q weights/bias;
    * zero-pad each head's q/k width to a multiple of `pad_head_to` lanes so
      in-kernel head slices are lane-aligned and QK^T fills a full MXU pass.
      Padded columns are exactly zero -> numerically identical results."""
    scale = 1.0 / math.sqrt(d_k)
    wq = raw["fc_q_wt"] * scale
    bq = raw["fc_q_b"] * scale
    wk = raw["fc_k_wt"]
    bk = raw["fc_k_b"]

    d_kp = d_k
    if pad_head_to and (d_k % pad_head_to != 0):
        d_kp = ((d_k + pad_head_to - 1) // pad_head_to) * pad_head_to
        pad = d_kp - d_k

        def pad_w(w):
            w3 = w.reshape(d_model, h, d_k)
            return jnp.pad(w3, ((0, 0), (0, 0), (0, pad))).reshape(d_model, h * d_kp)

        def pad_b(b):
            b2 = b.reshape(h, d_k)
            return jnp.pad(b2, ((0, 0), (0, pad))).reshape(h * d_kp)

        wq, bq = pad_w(wq), pad_b(bq)
        wk, bk = pad_w(wk), pad_b(bk)

    return {
        "fc_q_wt": wq, "fc_q_b": bq,
        "fc_k_wt": wk, "fc_k_b": bk,
        "fc_v_wt": raw["fc_v_wt"], "fc_v_b": raw["fc_v_b"],
        "fc_o_wt": raw["fc_o_wt"], "fc_o_b": raw["fc_o_b"],
        "d_k_padded": d_kp,
    }


def scaled_dot_product_attention(params, queries, keys, values,
                                 d_model, d_k, d_v, h):
    """queries: (b_s, nq, d_model), keys/values: (b_s, nk, d_model)."""
    del d_k  # scale & padding already folded into the prepared params
    b_s, nq, _ = queries.shape
    nk = keys.shape[1]
    d_kp = params["d_k_padded"]

    # Projections (M/N/K-tiled Pallas matmul+bias on flattened (b*n, d_model)).
    q = pallas_linear(queries.reshape(b_s * nq, d_model),
                      params["fc_q_wt"], params["fc_q_b"])
    k = pallas_linear(keys.reshape(b_s * nk, d_model),
                      params["fc_k_wt"], params["fc_k_b"])
    v = pallas_linear(values.reshape(b_s * nk, d_model),
                      params["fc_v_wt"], params["fc_v_b"])

    # Free reshapes only — no HBM transposes; heads are split in-kernel with
    # lane-aligned slices.
    q = q.reshape(b_s, nq, h * d_kp)
    k = k.reshape(b_s, nk, h * d_kp)
    v = v.reshape(b_s, nk, h * d_v)

    # attention_mask / attention_weights default to None -> not applied.
    # fc_o (weights + bias) is fused into the attention kernel epilogue.
    out = pallas_fused_attention(q, k, v, params["fc_o_wt"], params["fc_o_b"],
                                 h=h, d_kp=d_kp, d_v=d_v, d_model=d_model)
    return out  # (b_s, nq, d_model)


# ----------------------------------------------------------------------------
# Reference (pure JAX, mirrors the PyTorch module) for sanity check
# ----------------------------------------------------------------------------
def reference_forward(params, queries, keys, values, d_model, d_k, d_v, h):
    b_s, nq, _ = queries.shape
    nk = keys.shape[1]
    q = queries @ params["fc_q_wt"] + params["fc_q_b"]
    k = keys @ params["fc_k_wt"] + params["fc_k_b"]
    v = values @ params["fc_v_wt"] + params["fc_v_b"]
    q = q.reshape(b_s, nq, h, d_k).transpose(0, 2, 1, 3)
    k = k.reshape(b_s, nk, h, d_k).transpose(0, 2, 3, 1)
    v = v.reshape(b_s, nk, h, d_v).transpose(0, 2, 1, 3)
    att = (q @ k) / np.sqrt(d_k)
    att = jax.nn.softmax(att, axis=-1)
    out = (att @ v).transpose(0, 2, 1, 3).reshape(b_s, nq, h * d_v)
    return out @ params["fc_o_wt"] + params["fc_o_b"]


if __name__ == "__main__":
    d_model, d_k, d_v, h = 32, 16, 16, 4
    b_s, nq, nk = 2, 8, 8

    key = jax.random.PRNGKey(0)
    kp, kq, kk, kv = jax.random.split(key, 4)

    raw_params = init_params(kp, d_model, d_k, d_v, h)
    params = prepare_params(raw_params, d_model=d_model, d_k=d_k, d_v=d_v, h=h)

    queries = jax.random.normal(kq, (b_s, nq, d_model), jnp.float32)
    keys = jax.random.normal(kk, (b_s, nk, d_model), jnp.float32)
    values = jax.random.normal(kv, (b_s, nk, d_model), jnp.float32)

    out = scaled_dot_product_attention(params, queries, keys, values,
                                       d_model, d_k, d_v, h)
    out = jax.block_until_ready(out)

    ref = reference_forward(raw_params, queries, keys, values, d_model, d_k, d_v, h)
    np.testing.assert_allclose(np.asarray(out), np.asarray(ref),
                               rtol=5e-4, atol=1e-5)
    print("KERNEL_OK")
</pallas_src>

<mosaic_0001>
module attributes {stable_mosaic.version = 11 : i64} {
  func.func @linear_kernel(%arg0: i32, %arg1: i32, %arg2: i32, %arg3: memref<16x32xf32, #tpu.memory_space<vmem>>, %arg4: memref<32x512xf32, #tpu.memory_space<vmem>>, %arg5: memref<1x512xf32, #tpu.memory_space<vmem>>, %arg6: memref<16x512xf32, #tpu.memory_space<vmem>>, %arg7: memref<16x512xf32, #tpu.memory_space<vmem>>) attributes {dimension_semantics = [#tpu.dimension_semantics<parallel>, #tpu.dimension_semantics<parallel>, #tpu.dimension_semantics<arbitrary>], iteration_bounds = array<i64: 1, 1, 1>, scalar_prefetch = 0 : i64, scratch_operands = 1 : i64, tpu.core_type = #tpu.core_type<tc>, window_params = [{transform_indices = @transform_0, window_bounds = array<i64: 16, 32>}, {transform_indices = @transform_1, window_bounds = array<i64: 32, 512>}, {transform_indices = @transform_2, window_bounds = array<i64: 1, 512>}, {transform_indices = @transform_3, window_bounds = array<i64: 16, 512>}]} {
    %c0_i32 = arith.constant 0 : i32
    %0 = arith.cmpi eq, %arg2, %c0_i32 : i32
    %1 = arith.extui %0 : i1 to i32
    %c0_i32_0 = arith.constant 0 : i32
    %2 = arith.cmpi ne, %1, %c0_i32_0 : i32
    scf.if %2 {
      %cst_10 = arith.constant 0.000000e+00 : f32
      %12 = vector.broadcast %cst_10 : f32 to vector<16x512xf32>
      %c0_11 = arith.constant 0 : index
      %c0_12 = arith.constant 0 : index
      %13 = vector.load %arg7[%c0_11, %c0_12] : memref<16x512xf32, #tpu.memory_space<vmem>>, vector<16x512xf32>
      tpu.vector_store %arg7[%c0_11, %c0_12], %12 {strides = array<i32>} : memref<16x512xf32, #tpu.memory_space<vmem>>, vector<16x512xf32>,
    } else {
    }
    %c0 = arith.constant 0 : index
    %c0_1 = arith.constant 0 : index
    %3 = vector.load %arg7[%c0, %c0_1] : memref<16x512xf32, #tpu.memory_space<vmem>>, vector<16x512xf32>
    %c0_2 = arith.constant 0 : index
    %c0_3 = arith.constant 0 : index
    %4 = vector.load %arg3[%c0_2, %c0_3] : memref<16x32xf32, #tpu.memory_space<vmem>>, vector<16x32xf32>
    %c0_4 = arith.constant 0 : index
    %c0_5 = arith.constant 0 : index
    %5 = vector.load %arg4[%c0_4, %c0_5] : memref<32x512xf32, #tpu.memory_space<vmem>>, vector<32x512xf32>
    %cst = arith.constant dense<0.000000e+00> : vector<16x512xf32>
    %6 = tpu.matmul %4, %5, %cst {dimension_numbers = #tpu.dot_dimension_numbers<[1], [0], [0], [1], [0, 0, 1, 1], [], []>} : vector<16x32xf32>, vector<32x512xf32>, vector<16x512xf32> -> vector<16x512xf32>
    %7 = arith.addf %3, %6 : vector<16x512xf32>
    %c0_6 = arith.constant 0 : index
    %c0_7 = arith.constant 0 : index
    %8 = vector.load %arg7[%c0_6, %c0_7] : memref<16x512xf32, #tpu.memory_space<vmem>>, vector<16x512xf32>
    tpu.vector_store %arg7[%c0_6, %c0_7], %7 {strides = array<i32>} : memref<16x512xf32, #tpu.memory_space<vmem>>, vector<16x512xf32>,
    %c0_i32_8 = arith.constant 0 : i32
    %9 = arith.cmpi eq, %arg2, %c0_i32_8 : i32
    %10 = arith.extui %9 : i1 to i32
    %c0_i32_9 = arith.constant 0 : i32
    %11 = arith.cmpi ne, %10, %c0_i32_9 : i32
    scf.if %11 {
      %c0_10 = arith.constant 0 : index
      %c0_11 = arith.constant 0 : index
      %12 = vector.load %arg7[%c0_10, %c0_11] : memref<16x512xf32, #tpu.memory_space<vmem>>, vector<16x512xf32>
      %c0_12 = arith.constant 0 : index
      %c0_13 = arith.constant 0 : index
      %13 = vector.load %arg5[%c0_12, %c0_13] : memref<1x512xf32, #tpu.memory_space<vmem>>, vector<1x512xf32>
      %14 = vector.broadcast %13 : vector<1x512xf32> to vector<16x512xf32>
      %15 = arith.addf %12, %14 : vector<16x512xf32>
      %c0_14 = arith.constant 0 : index
      %c0_15 = arith.constant 0 : index
      %16 = vector.load %arg6[%c0_14, %c0_15] : memref<16x512xf32, #tpu.memory_space<vmem>>, vector<16x512xf32>
      tpu.vector_store %arg6[%c0_14, %c0_15], %15 {strides = array<i32>} : memref<16x512xf32, #tpu.memory_space<vmem>>, vector<16x512xf32>,
    } else {
    }
    return
  }
  func.func @transform_0(%arg0: i32, %arg1: i32, %arg2: i32) -> (i32, i32) {
    %c0_i32 = arith.constant 0 : i32
    return %arg0, %arg2 : i32, i32
  }
  func.func @transform_1(%arg0: i32, %arg1: i32, %arg2: i32) -> (i32, i32) {
    %c0_i32 = arith.constant 0 : i32
    return %arg2, %arg1 : i32, i32
  }
  func.func @transform_2(%arg0: i32, %arg1: i32, %arg2: i32) -> (i32, i32) {
    %c0_i32 = arith.constant 0 : i32
    %c0_i32_0 = arith.constant 0 : i32
    return %c0_i32, %arg1 : i32, i32
  }
  func.func @transform_3(%arg0: i32, %arg1: i32, %arg2: i32) -> (i32, i32) {
    %c0_i32 = arith.constant 0 : i32
    return %arg0, %arg1 : i32, i32
  }
}

</mosaic_0001>

<bundles_post_ra>
// kernel: tpu_custom_call.1
= control target key start
LH: loop header
LB: loop body
LE: loop exit
PB: predicated region body
PF: predicated region fallthrough
CT: control target
= control target key end

     0   :  { %8 = vsyncpa [#allocation4], 0  ;;  %s498_s0 = inlined_call_operand.hbm [shape: f32[16,32], index: 0, kind: input, shape index: {}]   ;;  %s499_s1 = inlined_call_operand.hbm [shape: f32[32,512], index: 1, kind: input, shape index: {}]   ;;  %s500_s2 = inlined_call_operand.vmem [shape: f32[1,512], index: 2, kind: input, shape index: {}]   ;;  %s501_s3 = inlined_call_operand.hbm [shape: f32[16,512], index: 3, kind: output, shape index: {}]  }
   0x1   :  { %9 = vsyncpa [#allocation7], 0 }
   0x2   :  { %10 = vsyncpa [#allocation5], 0  ;;  %s425_s12 = smov [#allocation3]   ;;  %s353_s16 = scalar_lea.hbm %s498_s0, 256 }
   0x3   :  { %s16_s13 = sshll.u32 %s425_s12, 4  ;;  %p354_p0 = scmp.ne.s32.totalorder %s498_s0, %s353_s16  ;;  %s17_s13 = int_to_ptr.vmem [resolvable:$true] %s16_s13 }
   0x4   :  { %p357_p1 = scmp.lt.u32.totalorder %s353_s16, %s498_s0 }
   0x6   :  { %p359_p2 = pnand %p357_p1, %p354_p0 }
   0x8   :  { %362 = shalt.err (!%p359_p2)
}
   0x9   :  { %s363_s21 = scalar_lea.vmem %s17_s13, 256  ;;  %p368_p4 = scmp.lt.s32.totalorder %s17_s13, %s17_s13 }
   0xa   :  { %p364_p3 = scmp.ne.s32.totalorder %s17_s13, %s363_s21  ;;  %p369_p5 = scmp.lt.s32.totalorder %s363_s21, %s363_s21 }
   0xc   :  { %p370_p6 = por %p369_p5, %p368_p4 }
   0xe   :  { %p371_p7 = pnand %p370_p6, %p364_p3 }
  0x10   :  { %374 = shalt.err (!%p371_p7)
}
  0x11   :  { %s426_s22 = smov 128   ;;  %s427_s23 = smov 8  }
  0x12   :  { %22 = dma.hbm_to_vmem [thread:$0]  %s498_s0, 256, %s17_s13, [#allocation4], %s426_s22, %s426_s22, %s427_s23  }
  0x13   :  { %s428_s26 = smov [#allocation6]   ;;  %s375_s30 = scalar_lea.hbm %s499_s1, 2048 }
  0x14   :  { %s28_s27 = sshll.u32 %s428_s26, 4  ;;  %p376_p8 = scmp.ne.s32.totalorder %s499_s1, %s375_s30  ;;  %s29_s27 = int_to_ptr.vmem [resolvable:$true] %s28_s27 }
  0x15   :  { %p379_p9 = scmp.lt.u32.totalorder %s375_s30, %s499_s1 }
  0x17   :  { %p381_p10 = pnand %p379_p9, %p376_p8 }
  0x19   :  { %384 = shalt.err (!%p381_p10)
}
  0x1a   :  { %s385_s8 = scalar_lea.vmem %s29_s27, 2048  ;;  %p390_p12 = scmp.lt.s32.totalorder %s29_s27, %s29_s27 }
  0x1b   :  { %p386_p11 = scmp.ne.s32.totalorder %s29_s27, %s385_s8  ;;  %p391_p13 = scmp.lt.s32.totalorder %s385_s8, %s385_s8 }
  0x1d   :  { %p392_p0 = por %p391_p13, %p390_p12 }
  0x1f   :  { %p393_p1 = pnand %p392_p0, %p386_p11 }
  0x21   :  { %396 = shalt.err (!%p393_p1)
}
  0x22   :  { %s429_s0 = smov 512   ;;  %s430_s9 = smov 32  }
  0x23   :  { %34 = dma.hbm_to_vmem [thread:$0]  %s499_s1, 2048, %s29_s27, [#allocation7], %s429_s0, %s429_s0, %s430_s9  }
  0x24   :  { %419 = dma.done.wait [#allocation4], 256  }
  0x25   :  { %420 = vsyncadd [#allocation4], 4294967040 }
  0x26   :  { %421 = dma.done.wait [#allocation7], 2048  }
  0x27   :  { %422 = vsyncadd [#allocation7], 4294965248  ;;  %v431_v0 = vmov 0.0   ;;  %v66_v1 = vld [vmem:[#allocation6 + $0x8] sm:$0xff]  ;;  %v68_v3 = vld [vmem:[#allocation6 + $0x18] sm:$0xff]  ;;  %vm81_vm0 = vcmask 261120   ;;  %v271_v27 = vlaneseq }
  0x28   :  { %152 = vmatprep.mubr.f32.mxu0 %v431_v0  ;;  %229 = vmatprep.mubr.f32.mxu1 %v431_v0  ;;  %v70_v2 = vld [vmem:[#allocation6 + $0x28] sm:$0xff]  ;;  %v72_v5 = vld [vmem:[#allocation6 + $0x38] sm:$0xff]  ;;  %v65_v6 = vld [vmem:[#allocation6] sm:$0xff] }
  0x29   :  { %v329_v4 = vpack.c.bf16 %v70_v2, %v66_v1  ;;  %v69_v7 = vld [vmem:[#allocation6 + $0x20] sm:$0xff]  ;;  %v337_v8 = vpack.c.bf16 %v72_v5, %v68_v3  ;;  %v67_v10 = vld [vmem:[#allocation6 + $0x10] sm:$0xff]  ;;  %v74_v12 = vld [vmem:[#allocation6 + $0x48] sm:$0xff]  ;;  %v272_v28 = vshrl.u32 %v271_v27, 7 }
  0x2a   :  { %v331_v9 = vpack.c.bf16 %v69_v7, %v65_v6  ;;  %v71_v11 = vld [vmem:[#allocation6 + $0x30] sm:$0xff]  ;;  %v78_v14 = vld [vmem:[#allocation6 + $0x68] sm:$0xff]  ;;  %v76_v15 = vld [vmem:[#allocation6 + $0x58] sm:$0xff] }
  0x2b   :  { %330 = vmatprep.subr.bf16.mxu0 %v329_v4  ;;  %v339_v13 = vpack.c.bf16 %v71_v11, %v67_v10  ;;  %v80_v16 = vld [vmem:[#allocation6 + $0x78] sm:$0xff]  ;;  %338 = vmatprep.subr.bf16.mxu1 %v337_v8  ;;  %v333_v17 = vpack.c.bf16 %v78_v14, %v74_v12  ;;  %v73_v19 = vld [vmem:[#allocation6 + $0x40] sm:$0xff]  ;;  %v75_v21 = vld [vmem:[#allocation6 + $0x50] sm:$0xff]  ;;  %v273_v29 = vsub.s32 0, %v272_v28  ;;  %v281_v31 = vsub.s32 2, %v272_v28 }
  0x2c   :  { %332 = vmatpush1.bf16.msra.mxu0 %v331_v9  ;;  %v341_v18 = vpack.c.bf16 %v80_v16, %v76_v15  ;;  %v77_v20 = vld [vmem:[#allocation6 + $0x60] sm:$0xff]  ;;  %v79_v23 = vld [vmem:[#allocation6 + $0x70] sm:$0xff]  ;;  %v64_v26 = vld [vmem:[#allocation3 + $0x8] sm:$0xff]  ;;  %v277_v32 = vsub.s32 1, %v272_v28  ;;  %v285_v33 = vsub.s32 3, %v272_v28 }
  0x2d   :  { %340 = vmatpush1.bf16.msra.mxu1 %v339_v13  ;;  %v335_v22 = vpack.c.bf16 %v77_v20, %v73_v19  ;;  %334 = vmatprep.subr.bf16.mxu0 %v333_v17  ;;  %v343_v24 = vpack.c.bf16 %v79_v23, %v75_v21  ;;  %v63_v25 = vld [vmem:[#allocation3] sm:$0xff] }
  0x2e   :  { %342 = vmatprep.subr.bf16.mxu1 %v341_v18  ;;  %v269_v30 = vld [vmem:[%s500_s2] sm:$0xf]  ;;  %s432_s2 = smov [#allocation8]  }
  0x2f   :  { %v274_v34 = vrot.slane %v269_v30, %v273_v29  ;;  %v282_v35 = vrot.slane %v269_v30, %v281_v31  ;;  %v278_v36 = vrot.slane %v269_v30, %v277_v32  ;;  %v286_v37 = vrot.slane %v269_v30, %v285_v33  ;;  %s312_s13 = sshll.u32 %s432_s2, 4  ;;  %s313_s13 = int_to_ptr.vmem [resolvable:$true] %s312_s13 }
  0x30   :  { %336 = vmatpush1.bf16.msra.mxu0 %v335_v22  ;;  %s397_s14 = scalar_lea.vmem %s313_s13, 1024  ;;  %p402_p3 = scmp.lt.s32.totalorder %s313_s13, %s313_s13 }
  0x31   :  { %344 = vmatpush1.bf16.msra.mxu1 %v343_v24  ;;  %p398_p2 = scmp.ne.s32.totalorder %s313_s13, %s397_s14  ;;  %p403_p4 = scmp.lt.s32.totalorder %s397_s14, %s397_s14 }
  0x33   :  { %325 = vmatmul.mubr.msk.f32.vlgmr.msra.gmra.mrb[0].mxu0 %vm81_vm0, %v63_v25  ;;  %p404_p5 = por %p403_p4, %p402_p3 }
  0x34   :  { %327 = vmatmul.mubr.msk.f32.vlgmr.msra.gmra.mrb[0].mxu1 %vm81_vm0, %v63_v25  ;;  %158 = vmatprep.mubr.f32.mxu0 %v431_v0 }
  0x35   :  { %235 = vmatprep.mubr.f32.mxu1 %v431_v0  ;;  %p405_p6 = pnand %p404_p5, %p398_p2 }
  0x37   :  { %326 = vmatmul.mubr.msk.f32.gmra.mrb[2].mxu0 %vm81_vm0, %v64_v26 }
  0x38   :  { %328 = vmatmul.mubr.msk.f32.gmra.mrb[2].mxu1 %vm81_vm0, %v64_v26 }
 0x106   :  { %v154_v38 = vpop.f32.mrb[0].mxu0 }
 0x107   :  { %v291_v39 = vadd.f32 %v274_v34, %v154_v38  ;;  %v231_v40 = vpop.f32.mrb[0].mxu1  ;;  %v156_v41 = vpop.f32.mrb[1].mxu0 }
 0x108   :  { %v293_v42 = vadd.f32 %v282_v35, %v231_v40  ;;  %v292_v43 = vadd.f32 %v278_v36, %v156_v41  ;;  %v233_v44 = vpop.f32.mrb[1].mxu1 }
 0x109   :  { %299 = vst [vmem:[#allocation8] sm:$0xff] %v291_v39  ;;  %v294_v45 = vadd.f32 %v286_v37, %v233_v44 }
 0x10a   :  { %301 = vst [vmem:[#allocation8 + $0x10] sm:$0xff] %v293_v42  ;;  %300 = vst [vmem:[#allocation8 + $0x8] sm:$0xff] %v292_v43  ;;  %v160_v46 = vpop.f32.mrb[2].mxu0 }
 0x10b   :  { %302 = vst [vmem:[#allocation8 + $0x18] sm:$0xff] %v294_v45  ;;  %v295_v47 = vadd.f32 %v274_v34, %v160_v46  ;;  %v237_v48 = vpop.f32.mrb[2].mxu1  ;;  %v162_v49 = vpop.f32.mrb[3].mxu0 }
 0x10c   :  { %v297_v50 = vadd.f32 %v282_v35, %v237_v48  ;;  %v296_v51 = vadd.f32 %v278_v36, %v162_v49  ;;  %v239_v52 = vpop.f32.mrb[3].mxu1 }
 0x10d   :  { %303 = vst [vmem:[#allocation8 + $0x20] sm:$0xff] %v295_v47  ;;  %v298_v53 = vadd.f32 %v286_v37, %v239_v52 }
 0x10e   :  { %305 = vst [vmem:[#allocation8 + $0x30] sm:$0xff] %v297_v50  ;;  %304 = vst [vmem:[#allocation8 + $0x28] sm:$0xff] %v296_v51 }
 0x10f   :  { %306 = vst [vmem:[#allocation8 + $0x38] sm:$0xff] %v298_v53 }
 0x110   :  { %408 = shalt.err (!%p405_p6)
}
 0x111   :  { %s409_s17 = scalar_lea.hbm %s501_s3, 1024 }
 0x112   :  { %p410_p7 = scmp.ne.s32.totalorder %s501_s3, %s409_s17  ;;  %p413_p8 = scmp.lt.u32.totalorder %s409_s17, %s501_s3 }
 0x114   :  { %p415_p9 = pnand %p413_p8, %p410_p7 }
 0x116   :  { %418 = shalt.err (!%p415_p9)
}
 0x117   :  { %318 = dma.vmem_to_hbm [thread:$0]  %s313_s13, 1024, %s501_s3, [#allocation5], %s429_s0, %s429_s0, %s430_s9  }
 0x118   :  { %423 = dma.done.wait [#allocation5], 1024  }
 0x119   :  { %424 = vsyncadd [#allocation5], 4294966272 }
 0x11a   :  { %322 = vsyncpa [#allocation4], 1 }
 0x11b   :  { %323 = vsyncpa [#allocation7], 1 }
 0x11c   :  { %324 = vsyncpa [#allocation5], 1 }

</bundles_post_ra>
